<compile_context>
chip_gen: v5e
topology: v5e:2x2
jax: 0.10.0
libtpu: 0.0.40
codegen_flags: <defaults>
</compile_context>

<pallas_src>
import functools

import jax
import jax.numpy as jnp
from jax.experimental import pallas as pl
from jax.experimental.pallas import tpu as pltpu


# ---------------------------------------------------------------------------
# Kernel
# ---------------------------------------------------------------------------
def lstm_cell_kernel(xh_ref, cs_ref, w_ref, b_ref, cs_out_ref, hs_out_ref):
    """One (hidden-tile, batch-tile) block of the LSTM cell.

    xh_ref : (tB, K_pad)     bf16   fused [x, hs]
    cs_ref : (tB, tH)        f32
    w_ref  : (K_pad, 4*tH)   bf16   columns = [f | i | g | o], each tH wide
    b_ref  : (1, 4*tH)       f32
    """
    tH = cs_ref.shape[-1]

    # Single wide MXU contraction for all four gates, f32 accumulation.
    gates = jnp.dot(xh_ref[...], w_ref[...], preferred_element_type=jnp.float32)
    gates = gates + b_ref[...]

    # Static, 128-aligned lane slices (tH is a multiple of 128).
    forget_gate = jax.nn.sigmoid(gates[:, 0 * tH:1 * tH])
    input_gate = jax.nn.sigmoid(gates[:, 1 * tH:2 * tH])
    candidate = jnp.tanh(gates[:, 2 * tH:3 * tH])
    output_gate = jax.nn.sigmoid(gates[:, 3 * tH:4 * tH])

    cs_new = forget_gate * cs_ref[...] + input_gate * candidate
    hs_new = output_gate * jnp.tanh(cs_new)

    cs_out_ref[...] = cs_new.astype(cs_out_ref.dtype)
    hs_out_ref[...] = hs_new.astype(hs_out_ref.dtype)


# ---------------------------------------------------------------------------
# Layout / tiling helpers
# ---------------------------------------------------------------------------
def _round_up(n, m):
    return ((n + m - 1) // m) * m


@functools.lru_cache(maxsize=1)
def _vmem_plan():
    """(vmem_limit_bytes, buffer_budget_bytes) chosen per TPU generation."""
    cap = 64 * 1024 * 1024  # conservative fallback (v7x per-TC physical VMEM)
    try:
        info = pltpu.get_tpu_info()
        cap = int(getattr(info, "vmem_capacity_bytes", cap) or cap)
    except Exception:
        pass
    if cap <= 64 * 1024 * 1024:
        limit = 48 * 1024 * 1024      # v7x-safe
    else:
        limit = 96 * 1024 * 1024      # v5e / v6e (128 MiB physical)
    budget = limit - 8 * 1024 * 1024  # headroom for compiler scratch
    return limit, budget


def _choose_h_tile(K_pad, H_pad, w_budget):
    """Largest hidden tile whose double-buffered bf16 weight slab fits w_budget.

    Prefers >=2 hidden tiles when H_pad >= 256 so v7x megacore can shard the
    (parallel) hidden axis across its two TensorCores.
    """
    cands = [h for h in range(128, H_pad + 1, 128) if H_pad % h == 0]
    cands.sort(reverse=True)
    if H_pad >= 256 and len(cands) > 1:
        cands = cands[1:] + cands[:1]  # keep full-H only as a last resort
    for tH in cands:
        if 2 * (K_pad * 4 * tH * 2) <= w_budget:
            return tH
    return 128


def _choose_b_tile(B, K_pad, tH, budget_rest):
    """Largest batch tile (MXU-height preferred) whose activation buffers fit."""
    b_hint = _round_up(max(B, 1), 16)
    cands = [b for b in (256, 128, 64, 32, 16) if b <= b_hint] or [16]
    for tB in cands:
        need = (2 * tB * K_pad * 2          # xh, double-buffered, bf16
                + 3 * 2 * tB * tH * 4       # cs in + cs out + hs out, dbl-buf f32
                + 2 * tB * 4 * tH * 4)      # f32 gate intermediates (+ margin)
        if need <= budget_rest:
            return tB
    return 16


def prepare_params(w, b, input_size, hidden_size, compute_dtype=jnp.bfloat16):
    """Convert torch-layout params to kernel layout. Call ONCE per model.

    w : (4*hidden, input_size + hidden)  -- nn.Linear weight, gate rows [f,i,g,o]
    b : (4*hidden,)
    Returns
    w_k : (K_pad, 4*H_pad) compute_dtype -- per-hidden-tile interleaved [f|i|g|o]
    b_k : (1, 4*H_pad)     float32       -- same interleaving
    """
    H = hidden_size
    K = input_size + H
    K_pad = _round_up(K, 128)
    H_pad = _round_up(H, 128)
    _, budget = _vmem_plan()
    tH = _choose_h_tile(K_pad, H_pad, budget // 2)
    n_t = H_pad // tH

    w_g = w.reshape(4, H, K)                     # (4, H, K), gate-major [f,i,g,o]
    w_t = jnp.transpose(w_g, (2, 0, 1))          # (K, 4, H)  -> x @ W layout
    w_t = jnp.pad(w_t, ((0, K_pad - K), (0, 0), (0, H_pad - H)))
    # Interleave gates per hidden tile: tile hi's columns are [f|i|g|o], tH each.
    w_t = w_t.reshape(K_pad, 4, n_t, tH).transpose(0, 2, 1, 3)
    w_k = w_t.reshape(K_pad, 4 * H_pad).astype(compute_dtype)

    b_g = jnp.pad(b.reshape(4, H).astype(jnp.float32), ((0, 0), (0, H_pad - H)))
    b_k = b_g.reshape(4, n_t, tH).transpose(1, 0, 2).reshape(1, 4 * H_pad)
    return w_k, b_k


# ---------------------------------------------------------------------------
# Wrapper
# ---------------------------------------------------------------------------
@jax.jit
def lstm_cell(x, cs, hs, w_k, b_k):
    """Pallas LSTMCell forward (single step).

    x      : (B, input_size) float32
    cs, hs : (B, hidden)     float32
    w_k    : (K_pad, 4*H_pad) bf16  -- from prepare_params
    b_k    : (1, 4*H_pad)     f32   -- from prepare_params
    Returns (cs_new, hs_new) float32, same semantics as the PyTorch module.
    """
    B, input_size = x.shape
    H = cs.shape[-1]
    K = input_size + H
    K_pad = w_k.shape[0]
    H_pad = w_k.shape[1] // 4

    vmem_limit, budget = _vmem_plan()
    tH = _choose_h_tile(K_pad, H_pad, budget // 2)        # must match prepare_params
    w_bytes = 2 * (K_pad * 4 * tH * 2) + 2 * (4 * tH * 4)
    tB = _choose_b_tile(B, K_pad, tH, budget - w_bytes)
    B_pad = _round_up(max(B, 1), tB)

    # Lane-dense padding; fused [x, hs] operand for a single full-K contraction.
    xh = jnp.concatenate([x, hs], axis=-1).astype(w_k.dtype)         # (B, K) bf16
    xh = jnp.pad(xh, ((0, B_pad - B), (0, K_pad - K)))
    cs_p = jnp.pad(cs.astype(jnp.float32), ((0, B_pad - B), (0, H_pad - H)))

    # Grid: hidden tiles SLOW, batch tiles FAST -> each weight slab is fetched
    # from HBM exactly once (its block index is constant across the batch loop).
    grid = (H_pad // tH, B_pad // tB)

    cs_new, hs_new = pl.pallas_call(
        lstm_cell_kernel,
        out_shape=(
            jax.ShapeDtypeStruct((B_pad, H_pad), jnp.float32),
            jax.ShapeDtypeStruct((B_pad, H_pad), jnp.float32),
        ),
        grid=grid,
        in_specs=[
            pl.BlockSpec((tB, K_pad), lambda hi, bi: (bi, 0)),        # fused [x, hs]
            pl.BlockSpec((tB, tH), lambda hi, bi: (bi, hi)),          # cs
            pl.BlockSpec((K_pad, 4 * tH), lambda hi, bi: (0, hi)),    # weights (interleaved)
            pl.BlockSpec((1, 4 * tH), lambda hi, bi: (0, hi)),        # bias
        ],
        out_specs=(
            pl.BlockSpec((tB, tH), lambda hi, bi: (bi, hi)),          # cs_new
            pl.BlockSpec((tB, tH), lambda hi, bi: (bi, hi)),          # hs_new
        ),
        # In-place cell-state update: cs input buffer -> cs output buffer.
        input_output_aliases={1: 0},
        compiler_params=pltpu.CompilerParams(
            dimension_semantics=("parallel", "parallel"),
            vmem_limit_bytes=vmem_limit,
        ),
    )(xh, cs_p, w_k, b_k)

    return cs_new[:B, :H], hs_new[:B, :H]


# ---------------------------------------------------------------------------
# Init + reference (pure JAX, mirrors the PyTorch module)
# ---------------------------------------------------------------------------
def init_params(key, input_size, hidden_size):
    """Deterministic init mirroring LSTMCell.init_weight()."""
    combined = input_size + hidden_size
    stdv = 1.0 / jnp.sqrt(jnp.float32(hidden_size))
    kw, kb = jax.random.split(key)
    w = jax.random.uniform(kw, (4 * hidden_size, combined),
                           minval=-stdv, maxval=stdv, dtype=jnp.float32)
    b = jax.random.uniform(kb, (4 * hidden_size,),
                           minval=-stdv, maxval=stdv, dtype=jnp.float32)
    # bias.data[:hidden_size] = 1.0  (forget-gate bias; gate order is [f,i,g,o])
    b = b.at[:hidden_size].set(1.0)
    return w, b


def reference_lstm_cell(x, cs, hs, w, b):
    combined = jnp.concatenate([x, hs], axis=-1)
    gates = combined @ w.T + b
    H = hs.shape[-1]
    f, i, g, o = (gates[:, k * H:(k + 1) * H] for k in range(4))
    cs_new = jax.nn.sigmoid(f) * cs + jax.nn.sigmoid(i) * jnp.tanh(g)
    hs_new = jax.nn.sigmoid(o) * jnp.tanh(cs_new)
    return cs_new, hs_new


# ---------------------------------------------------------------------------
# Self-test
# ---------------------------------------------------------------------------
if __name__ == "__main__":
    B = 8
    input_size = 16
    hidden_size = 32

    key = jax.random.PRNGKey(0)
    k_param, k_x = jax.random.split(key)

    w, b = init_params(k_param, input_size, hidden_size)
    # One-time layout conversion (do NOT redo per step).
    w_k, b_k = prepare_params(w, b, input_size, hidden_size)

    x = jax.random.normal(k_x, (B, input_size), dtype=jnp.float32)
    # state=None path in the torch module: zero-initialized (cs, hs)
    cs0 = jnp.zeros((B, hidden_size), dtype=jnp.float32)
    hs0 = jnp.zeros((B, hidden_size), dtype=jnp.float32)

    cs_new, hs_new = lstm_cell(x, cs0, hs0, w_k, b_k)
    jax.block_until_ready((cs_new, hs_new))

    cs_ref, hs_ref = reference_lstm_cell(x, cs0, hs0, w, b)
    assert cs_new.shape == (B, hidden_size) and hs_new.shape == (B, hidden_size)
    # bf16 weights + f32 accumulation: tolerate small quantization error.
    assert jnp.allclose(cs_new, cs_ref, atol=2e-2, rtol=2e-2), \
        float(jnp.max(jnp.abs(cs_new - cs_ref)))
    assert jnp.allclose(hs_new, hs_ref, atol=2e-2, rtol=2e-2), \
        float(jnp.max(jnp.abs(hs_new - hs_ref)))

    print("KERNEL_OK")
</pallas_src>

<mosaic_0001>
module attributes {stable_mosaic.version = 11 : i64} {
  func.func @lstm_cell_kernel(%arg0: i32, %arg1: i32, %arg2: memref<16x128xbf16, #tpu.memory_space<vmem>>, %arg3: memref<16x128xf32, #tpu.memory_space<vmem>>, %arg4: memref<128x512xbf16, #tpu.memory_space<vmem>>, %arg5: memref<1x512xf32, #tpu.memory_space<vmem>>, %arg6: memref<16x128xf32, #tpu.memory_space<vmem>>, %arg7: memref<16x128xf32, #tpu.memory_space<vmem>>) attributes {dimension_semantics = [#tpu.dimension_semantics<parallel>, #tpu.dimension_semantics<parallel>], iteration_bounds = array<i64: 1, 1>, scalar_prefetch = 0 : i64, scratch_operands = 0 : i64, tpu.core_type = #tpu.core_type<tc>, window_params = [{transform_indices = @transform_0, window_bounds = array<i64: 16, 128>}, {transform_indices = @transform_1, window_bounds = array<i64: 16, 128>}, {transform_indices = @transform_2, window_bounds = array<i64: 128, 512>}, {transform_indices = @transform_3, window_bounds = array<i64: 1, 512>}, {transform_indices = @transform_4, window_bounds = array<i64: 16, 128>}, {transform_indices = @transform_5, window_bounds = array<i64: 16, 128>}]} {
    %c0 = arith.constant 0 : index
    %c0_0 = arith.constant 0 : index
    %0 = vector.load %arg2[%c0, %c0_0] : memref<16x128xbf16, #tpu.memory_space<vmem>>, vector<16x128xbf16>
    %c0_1 = arith.constant 0 : index
    %c0_2 = arith.constant 0 : index
    %1 = vector.load %arg4[%c0_1, %c0_2] : memref<128x512xbf16, #tpu.memory_space<vmem>>, vector<128x512xbf16>
    %cst = arith.constant dense<0.000000e+00> : vector<16x512xf32>
    %2 = tpu.matmul %0, %1, %cst {dimension_numbers = #tpu.dot_dimension_numbers<[1], [0], [0], [1], [0, 0, 1, 1], [], []>} : vector<16x128xbf16>, vector<128x512xbf16>, vector<16x512xf32> -> vector<16x512xf32>
    %c0_3 = arith.constant 0 : index
    %c0_4 = arith.constant 0 : index
    %3 = vector.load %arg5[%c0_3, %c0_4] : memref<1x512xf32, #tpu.memory_space<vmem>>, vector<1x512xf32>
    %4 = vector.broadcast %3 : vector<1x512xf32> to vector<16x512xf32>
    %5 = arith.addf %2, %4 : vector<16x512xf32>
    %6 = vector.extract_strided_slice %5 {offsets = [0, 0], sizes = [16, 128], strides = [1, 1]} : vector<16x512xf32> to vector<16x128xf32>
    %7 = arith.negf %6 : vector<16x128xf32>
    %8 = math.exp %7 : vector<16x128xf32>
    %cst_5 = arith.constant 1.000000e+00 : f32
    %9 = vector.broadcast %cst_5 : f32 to vector<16x128xf32>
    %10 = arith.addf %9, %8 : vector<16x128xf32>
    %11 = arith.divf %9, %10 : vector<16x128xf32>
    %12 = vector.extract_strided_slice %5 {offsets = [0, 128], sizes = [16, 128], strides = [1, 1]} : vector<16x512xf32> to vector<16x128xf32>
    %13 = arith.negf %12 : vector<16x128xf32>
    %14 = math.exp %13 : vector<16x128xf32>
    %cst_6 = arith.constant 1.000000e+00 : f32
    %15 = vector.broadcast %cst_6 : f32 to vector<16x128xf32>
    %16 = arith.addf %15, %14 : vector<16x128xf32>
    %17 = arith.divf %15, %16 : vector<16x128xf32>
    %18 = vector.extract_strided_slice %5 {offsets = [0, 256], sizes = [16, 128], strides = [1, 1]} : vector<16x512xf32> to vector<16x128xf32>
    %19 = math.tanh %18 : vector<16x128xf32>
    %20 = vector.extract_strided_slice %5 {offsets = [0, 384], sizes = [16, 128], strides = [1, 1]} : vector<16x512xf32> to vector<16x128xf32>
    %21 = arith.negf %20 : vector<16x128xf32>
    %22 = math.exp %21 : vector<16x128xf32>
    %cst_7 = arith.constant 1.000000e+00 : f32
    %23 = vector.broadcast %cst_7 : f32 to vector<16x128xf32>
    %24 = arith.addf %23, %22 : vector<16x128xf32>
    %25 = arith.divf %23, %24 : vector<16x128xf32>
    %c0_8 = arith.constant 0 : index
    %c0_9 = arith.constant 0 : index
    %26 = vector.load %arg3[%c0_8, %c0_9] : memref<16x128xf32, #tpu.memory_space<vmem>>, vector<16x128xf32>
    %27 = arith.mulf %11, %26 : vector<16x128xf32>
    %28 = arith.mulf %17, %19 : vector<16x128xf32>
    %29 = arith.addf %27, %28 : vector<16x128xf32>
    %30 = math.tanh %29 : vector<16x128xf32>
    %31 = arith.mulf %25, %30 : vector<16x128xf32>
    %c0_10 = arith.constant 0 : index
    %c0_11 = arith.constant 0 : index
    %32 = vector.load %arg6[%c0_10, %c0_11] : memref<16x128xf32, #tpu.memory_space<vmem>>, vector<16x128xf32>
    tpu.vector_store %arg6[%c0_10, %c0_11], %29 {strides = array<i32>} : memref<16x128xf32, #tpu.memory_space<vmem>>, vector<16x128xf32>,
    %c0_12 = arith.constant 0 : index
    %c0_13 = arith.constant 0 : index
    %33 = vector.load %arg7[%c0_12, %c0_13] : memref<16x128xf32, #tpu.memory_space<vmem>>, vector<16x128xf32>
    tpu.vector_store %arg7[%c0_12, %c0_13], %31 {strides = array<i32>} : memref<16x128xf32, #tpu.memory_space<vmem>>, vector<16x128xf32>,
    return
  }
  func.func @transform_0(%arg0: i32, %arg1: i32) -> (i32, i32) {
    %c0_i32 = arith.constant 0 : i32
    %c0_i32_0 = arith.constant 0 : i32
    return %arg1, %c0_i32 : i32, i32
  }
  func.func @transform_1(%arg0: i32, %arg1: i32) -> (i32, i32) {
    %c0_i32 = arith.constant 0 : i32
    return %arg1, %arg0 : i32, i32
  }
  func.func @transform_2(%arg0: i32, %arg1: i32) -> (i32, i32) {
    %c0_i32 = arith.constant 0 : i32
    %c0_i32_0 = arith.constant 0 : i32
    return %c0_i32, %arg0 : i32, i32
  }
  func.func @transform_3(%arg0: i32, %arg1: i32) -> (i32, i32) {
    %c0_i32 = arith.constant 0 : i32
    %c0_i32_0 = arith.constant 0 : i32
    return %c0_i32, %arg0 : i32, i32
  }
  func.func @transform_4(%arg0: i32, %arg1: i32) -> (i32, i32) {
    %c0_i32 = arith.constant 0 : i32
    return %arg1, %arg0 : i32, i32
  }
  func.func @transform_5(%arg0: i32, %arg1: i32) -> (i32, i32) {
    %c0_i32 = arith.constant 0 : i32
    return %arg1, %arg0 : i32, i32
  }
}

</mosaic_0001>

<bundles_post_ra>
// kernel: lstm_cell.1
= control target key start
LH: loop header
LB: loop body
LE: loop exit
PB: predicated region body
PF: predicated region fallthrough
CT: control target
= control target key end

     0   :  { %11 = vsyncpa [#allocation3], 0  ;;  %s674_s21 = smov [#allocation2]   ;;  %s675_s23 = smov 256   ;;  %s797_s0 = inlined_call_operand.vmem [shape: bf16[16,128], index: 0, kind: input, shape index: {}]   ;;  %s798_s1 = inlined_call_operand.vmem [shape: f32[16,128], index: 1, kind: input, shape index: {}, may-alias: {1,4}]   ;;  %s799_s2 = inlined_call_operand.hbm [shape: bf16[128,512], index: 2, kind: input, shape index: {}]   ;;  %s800_s3 = inlined_call_operand.vmem [shape: f32[1,512], index: 3, kind: input, shape index: {}]   ;;  %s801_s4 = inlined_call_operand.vmem [shape: f32[16,128], index: 4, kind: output, shape index: {0}, may-alias: {1,4}]   ;;  %s802_s5 = inlined_call_operand.vmem [shape: f32[16,128], index: 5, kind: output, shape index: {1}]  }
   0x1   :  { %s20_s20 = sshll.u32 %s799_s2, 4  ;;  %s22_s22 = sshll.u32 %s674_s21, 4  ;;  %s21_s20 = int_to_ptr.hbm [resolvable:$true] %s20_s20  ;;  %s23_s22 = int_to_ptr.vmem [resolvable:$true] %s22_s22 }
   0x2   :  { %s676_s24 = smov 16  }
   0x3   :  { %28 = dma.hbm_to_vmem [thread:$0]  %s21_s20, 4096, %s23_s22, [#allocation3], %s675_s23, %s675_s23, %s676_s24  }
   0x4   :  { %672 = dma.done.wait [#allocation3], 4096  }
   0x5   :  { %673 = vsyncadd [#allocation3], 4294963200  ;;  %v560_v0 = vld [vmem:[#allocation2 + $0xe0] sm:$0xf]  ;;  %v611_v1 = vld [vmem:[#allocation2 + $0xec] sm:$0xf0] }
   0x6   :  { %v609_v2 = vld [vmem:[#allocation2 + $0xe4] sm:$0xf]  ;;  %v561_v3 = vor.u32 %v611_v1, %v560_v0  ;;  %v562_v4 = vld [vmem:[#allocation2 + $0xf0] sm:$0xf0]  ;;  %v610_v5 = vld [vmem:[#allocation2 + $0xec] sm:$0xf] }
   0x7   :  { %v570_v6 = vld [vmem:[#allocation2 + $0xf8] sm:$0xf0]  ;;  %v565_v7 = vor.u32 %v609_v2, %v562_v4  ;;  %v544_v9 = vld [vmem:[#allocation2 + $0xc0] sm:$0xf]  ;;  %v607_v10 = vld [vmem:[#allocation2 + $0xcc] sm:$0xf0] }
   0x8   :  { %v573_v8 = vor.u32 %v610_v5, %v570_v6  ;;  %v605_v11 = vld [vmem:[#allocation2 + $0xc4] sm:$0xf]  ;;  %245 = vmatpush.bf16.msra.mxu0 %v561_v3  ;;  %v545_v12 = vor.u32 %v607_v10, %v544_v9  ;;  %v546_v13 = vld [vmem:[#allocation2 + $0xd0] sm:$0xf0]  ;;  %v606_v14 = vld [vmem:[#allocation2 + $0xcc] sm:$0xf] }
   0x9   :  { %v554_v15 = vld [vmem:[#allocation2 + $0xd8] sm:$0xf0]  ;;  %259 = vmatpush.bf16.msra.mxu1 %v565_v7  ;;  %v549_v16 = vor.u32 %v605_v11, %v546_v13  ;;  %v568_v18 = vld [vmem:[#allocation2 + $0xe8] sm:$0xf]  ;;  %v612_v19 = vld [vmem:[#allocation2 + $0xf4] sm:$0xf0] }
   0xa   :  { %287 = vmatpush.bf16.msra.mxu3 %v573_v8  ;;  %v557_v17 = vor.u32 %v606_v14, %v554_v15  ;;  %v528_v20 = vld [vmem:[#allocation2 + $0xa0] sm:$0xf]  ;;  %v569_v21 = vor.u32 %v612_v19, %v568_v18  ;;  %v603_v22 = vld [vmem:[#allocation2 + $0xac] sm:$0xf0]  ;;  %v601_v23 = vld [vmem:[#allocation2 + $0xa4] sm:$0xf] }
   0xb   :  { %v530_v24 = vld [vmem:[#allocation2 + $0xb0] sm:$0xf0]  ;;  %v602_v25 = vld [vmem:[#allocation2 + $0xac] sm:$0xf]  ;;  %v538_v26 = vld [vmem:[#allocation2 + $0xb8] sm:$0xf0]  ;;  %v529_v28 = vor.u32 %v603_v22, %v528_v20 }
   0xc   :  { %v552_v27 = vld [vmem:[#allocation2 + $0xc8] sm:$0xf]  ;;  %246 = vmatpush.bf16.msra.mxu0 %v545_v12  ;;  %273 = vmatpush.bf16.msra.mxu2 %v569_v21  ;;  %v608_v29 = vld [vmem:[#allocation2 + $0xd4] sm:$0xf0]  ;;  %v512_v30 = vld [vmem:[#allocation2 + $0x80] sm:$0xf]  ;;  %v533_v32 = vor.u32 %v601_v23, %v530_v24  ;;  %v541_v33 = vor.u32 %v602_v25, %v538_v26 }
   0xd   :  { %v599_v31 = vld [vmem:[#allocation2 + $0x8c] sm:$0xf0]  ;;  %260 = vmatpush.bf16.msra.mxu1 %v549_v16  ;;  %v553_v34 = vor.u32 %v608_v29, %v552_v27  ;;  %v597_v35 = vld [vmem:[#allocation2 + $0x84] sm:$0xf]  ;;  %v514_v36 = vld [vmem:[#allocation2 + $0x90] sm:$0xf0] }
   0xe   :  { %288 = vmatpush.bf16.msra.mxu3 %v557_v17  ;;  %v598_v37 = vld [vmem:[#allocation2 + $0x8c] sm:$0xf]  ;;  %v522_v38 = vld [vmem:[#allocation2 + $0x98] sm:$0xf0]  ;;  %v536_v39 = vld [vmem:[#allocation2 + $0xa8] sm:$0xf]  ;;  %v513_v41 = vor.u32 %v599_v31, %v512_v30  ;;  %v517_v45 = vor.u32 %v597_v35, %v514_v36 }
   0xf   :  { %v604_v40 = vld [vmem:[#allocation2 + $0xb4] sm:$0xf0]  ;;  %v496_v43 = vld [vmem:[#allocation2 + $0x60] sm:$0xf]  ;;  %v595_v44 = vld [vmem:[#allocation2 + $0x6c] sm:$0xf0]  ;;  %v525_v46 = vor.u32 %v598_v37, %v522_v38 }
  0x10   :  { %247 = vmatpush.bf16.msra.mxu0 %v529_v28  ;;  %274 = vmatpush.bf16.msra.mxu2 %v553_v34  ;;  %v537_v42 = vor.u32 %v604_v40, %v536_v39  ;;  %v593_v47 = vld [vmem:[#allocation2 + $0x64] sm:$0xf]  ;;  %v520_v48 = vld [vmem:[#allocation2 + $0x88] sm:$0xf]  ;;  %v600_v49 = vld [vmem:[#allocation2 + $0x94] sm:$0xf0]  ;;  %v497_v53 = vor.u32 %v595_v44, %v496_v43 }
  0x11   :  { %261 = vmatpush.bf16.msra.mxu1 %v533_v32  ;;  %v498_v50 = vld [vmem:[#allocation2 + $0x70] sm:$0xf0]  ;;  %v594_v51 = vld [vmem:[#allocation2 + $0x6c] sm:$0xf]  ;;  %v506_v52 = vld [vmem:[#allocation2 + $0x78] sm:$0xf0]  ;;  %v521_v54 = vor.u32 %v600_v49, %v520_v48 }
  0x12   :  { %289 = vmatpush.bf16.msra.mxu3 %v541_v33  ;;  %v480_v55 = vld [vmem:[#allocation2 + $0x40] sm:$0xf]  ;;  %v591_v56 = vld [vmem:[#allocation2 + $0x4c] sm:$0xf0]  ;;  %v501_v57 = vor.u32 %v593_v47, %v498_v50  ;;  %v509_v58 = vor.u32 %v594_v51, %v506_v52  ;;  %v589_v59 = vld [vmem:[#allocation2 + $0x44] sm:$0xf] }
  0x13   :  { %v504_v60 = vld [vmem:[#allocation2 + $0x68] sm:$0xf]  ;;  %v596_v61 = vld [vmem:[#allocation2 + $0x74] sm:$0xf0]  ;;  %v482_v62 = vld [vmem:[#allocation2 + $0x50] sm:$0xf0]  ;;  %v481_v1 = vor.u32 %v591_v56, %v480_v55 }
  0x14   :  { %248 = vmatpush.bf16.msra.mxu0 %v513_v41  ;;  %275 = vmatpush.bf16.msra.mxu2 %v537_v42  ;;  %v590_v63 = vld [vmem:[#allocation2 + $0x4c] sm:$0xf]  ;;  %v490_v0 = vld [vmem:[#allocation2 + $0x58] sm:$0xf0]  ;;  %v505_v2 = vor.u32 %v596_v61, %v504_v60  ;;  %v464_v3 = vld [vmem:[#allocation2 + $0x20] sm:$0xf]  ;;  %v485_v5 = vor.u32 %v589_v59, %v482_v62 }
  0x15   :  { %262 = vmatpush.bf16.msra.mxu1 %v517_v45  ;;  %v587_v4 = vld [vmem:[#allocation2 + $0x2c] sm:$0xf0]  ;;  %v493_v6 = vor.u32 %v590_v63, %v490_v0  ;;  %v585_v7 = vld [vmem:[#allocation2 + $0x24] sm:$0xf]  ;;  %v488_v8 = vld [vmem:[#allocation2 + $0x48] sm:$0xf] }
  0x16   :  { %290 = vmatpush.bf16.msra.mxu3 %v525_v46  ;;  %v592_v9 = vld [vmem:[#allocation2 + $0x54] sm:$0xf0]  ;;  %v466_v10 = vld [vmem:[#allocation2 + $0x30] sm:$0xf0]  ;;  %v586_v11 = vld [vmem:[#allocation2 + $0x2c] sm:$0xf]  ;;  %v465_v13 = vor.u32 %v587_v4, %v464_v3 }
  0x17   :  { %v474_v12 = vld [vmem:[#allocation2 + $0x38] sm:$0xf0]  ;;  %v489_v14 = vor.u32 %v592_v9, %v488_v8  ;;  %v448_v15 = vld [vmem:[#allocation2] sm:$0xf]  ;;  %v583_v16 = vld [vmem:[#allocation2 + $0xc] sm:$0xf0]  ;;  %v469_v17 = vor.u32 %v585_v7, %v466_v10 }
  0x18   :  { %249 = vmatpush.bf16.msra.mxu0 %v497_v53  ;;  %276 = vmatpush.bf16.msra.mxu2 %v521_v54  ;;  %v477_v18 = vor.u32 %v586_v11, %v474_v12  ;;  %v581_v19 = vld [vmem:[#allocation2 + $0x4] sm:$0xf]  ;;  %v472_v20 = vld [vmem:[#allocation2 + $0x28] sm:$0xf]  ;;  %v588_v21 = vld [vmem:[#allocation2 + $0x34] sm:$0xf0]  ;;  %v449_v25 = vor.u32 %v583_v16, %v448_v15 }
  0x19   :  { %263 = vmatpush.bf16.msra.mxu1 %v501_v57  ;;  %v450_v22 = vld [vmem:[#allocation2 + $0x10] sm:$0xf0]  ;;  %v582_v23 = vld [vmem:[#allocation2 + $0xc] sm:$0xf]  ;;  %v458_v24 = vld [vmem:[#allocation2 + $0x18] sm:$0xf0]  ;;  %v473_v26 = vor.u32 %v588_v21, %v472_v20 }
  0x1a   :  { %291 = vmatpush.bf16.msra.mxu3 %v509_v58  ;;  %v453_v27 = vor.u32 %v581_v19, %v450_v22  ;;  %v461_v28 = vor.u32 %v582_v23, %v458_v24  ;;  %v456_v29 = vld [vmem:[#allocation2 + $0x8] sm:$0xf]  ;;  %v584_v30 = vld [vmem:[#allocation2 + $0x14] sm:$0xf0]  ;;  %v580_v31 = vld [vmem:[%s797_s0] sm:$0xff] }
  0x1b   :  { %v457_v32 = vor.u32 %v584_v30, %v456_v29  ;;  %v716_v33 = vld [vmem:[%s800_s3] sm:$0xf] }
  0x1c   :  { %250 = vmatpush.bf16.msra.mxu0 %v481_v1  ;;  %277 = vmatpush.bf16.msra.mxu2 %v505_v2  ;;  %v71_v34 = vperm.slane %v716_v33, 0  ;;  %v72_v35 = vperm.slane %v716_v33, 1  ;;  %v74_v42 = vperm.slane %v716_v33, 3  ;;  %v73_v56 = vperm.slane %v716_v33, 2 }
  0x1d   :  { %264 = vmatpush.bf16.msra.mxu1 %v485_v5 }
  0x1e   :  { %292 = vmatpush.bf16.msra.mxu3 %v493_v6 }
  0x20   :  { %251 = vmatpush.bf16.msra.mxu0 %v465_v13  ;;  %278 = vmatpush.bf16.msra.mxu2 %v489_v14 }
  0x21   :  { %265 = vmatpush.bf16.msra.mxu1 %v469_v17 }
  0x22   :  { %293 = vmatpush.bf16.msra.mxu3 %v477_v18 }
  0x24   :  { %252 = vmatpush.bf16.msra.mxu0 %v449_v25  ;;  %279 = vmatpush.bf16.msra.mxu2 %v473_v26 }
  0x25   :  { %266 = vmatpush.bf16.msra.mxu1 %v453_v27 }
  0x26   :  { %294 = vmatpush.bf16.msra.mxu3 %v461_v28  ;;  %v417_v28 = vld [vmem:[%s798_s1] sm:$0xff] }
  0x27   :  { %253 = vmatmul.bf16.vlgmr.msra.gmra.mxu0 %v580_v31 }
  0x28   :  { %267 = vmatmul.bf16.vlgmr.msra.gmra.mxu1 %v580_v31  ;;  %280 = vmatpush.bf16.msra.mxu2 %v457_v32 }
  0x29   :  { %295 = vmatmul.bf16.vlgmr.msra.gmra.mxu3 %v580_v31 }
  0x2b   :  { %281 = vmatmul.bf16.vlgmr.msra.gmra.mxu2 %v580_v31 }
  0xa4   :  { %v254_v36 = vpop.f32.mrf.mxu0 }
  0xa5   :  { %v255_v37 = vadd.f32 %v254_v36, %v71_v34  ;;  %v268_v38 = vpop.f32.mrf.mxu1 }
  0xa6   :  { %v269_v39 = vadd.f32 %v268_v38, %v72_v35 }
  0xa7   :  { %v574_v40 = vmul.f32 -1.442695, %v255_v37 }
  0xa8   :  { %v576_v41 = vmul.f32 -1.442695, %v269_v39 }
  0xa9   :  { %616 = vpow2.f32 %v574_v40 }
  0xaa   :  { %618 = vpow2.f32 %v576_v41 }
  0xac   :  { %v296_v43 = vpop.f32.mrf.mxu3  ;;  %v256_v45 = vpop.f32.mrf.mxu0 }
  0xad   :  { %v297_v44 = vadd.f32 %v296_v43, %v74_v42  ;;  %v257_v46 = vadd.f32 %v256_v45, %v71_v34  ;;  %v270_v47 = vpop.f32.mrf.mxu1 }
  0xae   :  { %v271_v49 = vadd.f32 %v270_v47, %v72_v35  ;;  %v282_v58 = vpop.f32.mrf.mxu2 }
  0xaf   :  { %v578_v48 = vmul.f32 -1.442695, %v297_v44  ;;  %v617_v50 = vpop.eup %616  ;;  %v575_v51 = vmul.f32 -1.442695, %v257_v46  ;;  %v283_v0 = vadd.f32 %v282_v58, %v73_v56 }
  0xb0   :  { %v619_v52 = vpop.eup %618  ;;  %v307_v53 = vadd.f32 1.0, %v617_v50  ;;  %v577_v54 = vmul.f32 -1.442695, %v271_v49 }
  0xb1   :  { %620 = vpow2.f32 %v578_v48  ;;  %v345_v55 = vadd.f32 1.0, %v619_v52 }
  0xb2   :  { %622 = vpow2.f32 %v575_v51  ;;  %v320_v6 = vand.u32 2147483648, %v307_v53  ;;  %v318_v10 = vand.u32 2147483647, %v307_v53  ;;  %vm314_vm1 = vweird.f32 %v307_v53 }
  0xb3   :  { %624 = vrcp.f32 %v307_v53  ;;  %v356_v12 = vand.u32 2147483647, %v345_v55  ;;  %v358_v13 = vand.u32 2147483648, %v345_v55  ;;  %vm352_vm2 = vweird.f32 %v345_v55 }
  0xb4   :  { %626 = vrcp.f32 %v345_v55  ;;  %v298_v57 = vpop.f32.mrf.mxu3  ;;  %v321_v19 = vor.u32 1.1754944e-38, %v320_v6  ;;  %vm733_vm4 = vcmp.eq.f32.partialorder %v318_v10, 8.507059e+37 }
  0xb5   :  { %628 = vpow2.f32 %v577_v54  ;;  %v299_v59 = vadd.f32 %v298_v57, %v74_v42  ;;  %vm741_vm6 = vcmp.eq.f32.partialorder %v356_v12, 8.507059e+37  ;;  %v359_v27 = vor.u32 1.1754944e-38, %v358_v13 }
  0xb6   :  { %v284_v17 = vpop.f32.mrf.mxu2 }
  0xb7   :  { %v621_v60 = vpop.eup %620  ;;  %v579_v61 = vmul.f32 -1.442695, %v299_v59  ;;  %v285_v32 = vadd.f32 %v284_v17, %v73_v56 }
  0xb8   :  { %v623_v62 = vpop.eup %622  ;;  %v722_v63 = vadd.f32 1.0, %v621_v60 }
  0xb9   :  { %v625_v1 = vpop.eup %624  ;;  %v724_v2 = vadd.f32 1.0, %v623_v62  ;;  %630 = vpow2.f32 %v579_v61 }
  0xba   :  { %v627_v3 = vpop.eup %626  ;;  %v310_v4 = vmul.f32 %v625_v1, %v307_v53  ;;  %632 = vrcp.f32 %v722_v63  ;;  %vm315_vm0 = vweird.f32 %v625_v1  ;;  %vm392_vm8 = vweird.f32 %v722_v63 }
  0xbb   :  { %v629_v5 = vpop.eup %628  ;;  %v348_v7 = vmul.f32 %v627_v3, %v345_v55  ;;  %634 = vrcp.f32 %v724_v2  ;;  %vm353_vm3 = vweird.f32 %v627_v3  ;;  %vm316_vm5 = vmor %vm314_vm1, %vm315_vm0  ;;  %v335_v34 = vand.u32 2147483648, %v724_v2 }
  0xbc   :  { %v311_v8 = vsub.f32 1.0, %v310_v4  ;;  %v728_v9 = vadd.f32 1.0, %v629_v5  ;;  %636 = vtanh.f32 %v283_v0  ;;  %vm354_vm7 = vmor %vm352_vm2, %vm353_vm3  ;;  %v396_v42 = vand.u32 2147483647, %v722_v63 }
  0xbd   :  { %v349_v11 = vsub.f32 1.0, %v348_v7  ;;  %v398_v45 = vand.u32 2147483648, %v722_v63  ;;  %v333_v47 = vand.u32 2147483647, %v724_v2  ;;  %vm329_vm10 = vweird.f32 %v724_v2 }
  0xbe   :  { %v312_v14 = vmul.f32 %v625_v1, %v311_v8  ;;  %638 = vrcp.f32 %v728_v9  ;;  %v336_v48 = vor.u32 1.1754944e-38, %v335_v34  ;;  %v371_v55 = vand.u32 2147483647, %v728_v9 }
  0xbf   :  { %v631_v15 = vpop.eup %630  ;;  %v350_v16 = vmul.f32 %v627_v3, %v349_v11  ;;  %v373_v56 = vand.u32 2147483648, %v728_v9  ;;  %vm334_vm13 = vcmp.eq.f32.partialorder %v333_v47, 8.507059e+37  ;;  %vm367_vm0 = vweird.f32 %v728_v9 }
  0xc0   :  { %v731_v18 = vpop.eup %632  ;;  %v313_v20 = vadd.f32 %v625_v1, %v312_v14  ;;  %v737_v22 = vadd.f32 1.0, %v631_v15  ;;  %vm397_vm2 = vcmp.eq.f32.partialorder %v396_v42, 8.507059e+37  ;;  %vm372_vm3 = vcmp.eq.f32.partialorder %v371_v55, 8.507059e+37 }
  0xc1   :  { %v635_v23 = vpop.eup %634  ;;  %v388_v24 = vmul.f32 %v731_v18, %v722_v63  ;;  %v351_v25 = vadd.f32 %v627_v3, %v350_v16  ;;  %vm393_vm11 = vweird.f32 %v731_v18  ;;  %v374_v63 = vor.u32 1.1754944e-38, %v373_v56 }
  0xc2   :  { %v637_v29 = vpop.eup %636  ;;  %v325_v30 = vmul.f32 %v635_v23, %v724_v2  ;;  %v317_v31 = vsel %vm316_vm5, %v625_v1, %v313_v20  ;;  %640 = vrcp.f32 %v737_v22  ;;  %vm330_vm9 = vweird.f32 %v635_v23  ;;  %vm774_vm15 = vmor %vm392_vm8, %vm393_vm11 }
  0xc3   :  { %v389_v33 = vsub.f32 1.0, %v388_v24  ;;  %v322_v35 = vsel %vm733_vm4, %v321_v19, %v317_v31  ;;  %v355_v36 = vsel %vm354_vm7, %v627_v3, %v351_v25  ;;  %642 = vtanh.f32 %v285_v32  ;;  %vm331_vm12 = vmor %vm329_vm10, %vm330_vm9 }
  0xc4   :  { %v639_v37 = vpop.eup %638  ;;  %v326_v38 = vsub.f32 1.0, %v325_v30  ;;  %v360_v39 = vsel %vm741_vm6, %v359_v27, %v355_v36  ;;  %v419_v40 = vmul.f32 %v417_v28, %v322_v35  ;;  %v399_v2 = vor.u32 1.1754944e-38, %v398_v45 }
  0xc5   :  { %v390_v41 = vmul.f32 %v731_v18, %v389_v33  ;;  %v363_v43 = vmul.f32 %v639_v37, %v728_v9  ;;  %v421_v44 = vmul.f32 %v637_v29, %v360_v39  ;;  %vm368_vm14 = vweird.f32 %v639_v37 }
  0xc6   :  { %v327_v46 = vmul.f32 %v635_v23, %v326_v38  ;;  %vm369_vm1 = vmor %vm367_vm0, %vm368_vm14  ;;  %v413_v14 = vand.u32 2147483648, %v737_v22  ;;  %vm407_vm5 = vweird.f32 %v737_v22  ;;  %v411_v15 = vand.u32 2147483647, %v737_v22 }
  0xc7   :  { %v364_v49 = vsub.f32 1.0, %v363_v43  ;;  %v423_v50 = vadd.f32 %v421_v44, %v419_v40  ;;  %v391_v52 = vadd.f32 %v731_v18, %v390_v41 }
  0xc8   :  { %v641_v51 = vpop.eup %640  ;;  %v328_v53 = vadd.f32 %v635_v23, %v327_v46  ;;  %v414_v17 = vor.u32 1.1754944e-38, %v413_v14  ;;  %vm412_vm7 = vcmp.eq.f32.partialorder %v411_v15, 8.507059e+37 }
  0xc9   :  { %644 = vtanh.f32 %v423_v50  ;;  %429 = vst [vmem:[%s801_s4] sm:$0xff] %v423_v50  ;;  %v403_v54 = vmul.f32 %v641_v51, %v737_v22  ;;  %v365_v58 = vmul.f32 %v639_v37, %v364_v49  ;;  %v395_v0 = vsel %vm774_vm15, %v731_v18, %v391_v52  ;;  %v643_v3 = vpop.eup %642 }
  0xca   :  { %v332_v57 = vsel %vm331_vm12, %v635_v23, %v328_v53  ;;  %v400_v7 = vsel %vm397_vm2, %v399_v2, %v395_v0  ;;  %vm408_vm4 = vweird.f32 %v641_v51 }
  0xcb   :  { %v404_v60 = vsub.f32 1.0, %v403_v54  ;;  %v337_v61 = vsel %vm334_vm13, %v336_v48, %v332_v57  ;;  %v366_v1 = vadd.f32 %v639_v37, %v365_v58  ;;  %vm409_vm6 = vmor %vm407_vm5, %vm408_vm4 }
  0xcd   :  { %v370_v4 = vsel %vm369_vm1, %v639_v37, %v366_v1  ;;  %v405_v8 = vmul.f32 %v641_v51, %v404_v60 }
  0xce   :  { %v375_v10 = vsel %vm372_vm3, %v374_v63, %v370_v4 }
  0xcf   :  { %v645_v6 = vpop.eup %644  ;;  %v422_v12 = vmul.f32 %v643_v3, %v375_v10  ;;  %v406_v9 = vadd.f32 %v641_v51, %v405_v8 }
  0xd0   :  { %v418_v62 = vld [vmem:[%s798_s1 + $0x8] sm:$0xff]  ;;  %v427_v11 = vmul.f32 %v645_v6, %v400_v7 }
  0xd1   :  { %v420_v5 = vmul.f32 %v418_v62, %v337_v61  ;;  %v410_v16 = vsel %vm409_vm6, %v641_v51, %v406_v9 }
  0xd2   :  { %431 = vst [vmem:[%s802_s5] sm:$0xff] %v427_v11  ;;  %v415_v19 = vsel %vm412_vm7, %v414_v17, %v410_v16 }
  0xd3   :  { %v424_v13 = vadd.f32 %v422_v12, %v420_v5 }
  0xd5   :  { %646 = vtanh.f32 %v424_v13  ;;  %430 = vst [vmem:[%s801_s4 + $0x8] sm:$0xff] %v424_v13 }
  0xdb   :  { %v647_v18 = vpop.eup %646 }
  0xdc   :  { %v428_v20 = vmul.f32 %v647_v18, %v415_v19 }
  0xde   :  { %432 = vst [vmem:[%s802_s5 + $0x8] sm:$0xff] %v428_v20 }
  0xdf   :  { %441 = vsyncpa [#allocation3], 1 }

</bundles_post_ra>
